<compile_context>
chip_gen: v7x
topology: tpu7x:2x2x1
jax: 0.10.0
libtpu: 0.0.40
codegen_flags: <defaults>
</compile_context>

<pallas_src>
import functools

import jax
import jax.numpy as jnp
from jax.experimental import pallas as pl
from jax.experimental.pallas import tpu as pltpu

EPS = 1e-5          # torch.nn.GroupNorm default eps
NUM_GROUPS = 8      # GN_8 -> GroupNorm(8, num_channels)


def _round_up(x, m):
    return (x + m - 1) // m * m


def _vmem_budget_bytes():
    """Physical VMEM of the attached chip minus headroom (generation-aware)."""
    try:
        cap = int(pltpu.get_tpu_info().vmem_capacity_bytes)
    except Exception:
        cap = 64 * 1024 * 1024   # conservative (v7x-sized) default
    return cap - 8 * 1024 * 1024


# ----------------------------------------------------------------------------
# Fused single-pass kernel: one (Nb*C, HWp) slab per grid step.
# ----------------------------------------------------------------------------
def _gn_fused_kernel(x_ref, w_ref, b_ref, agg_ref, scat_ref, o_ref, *,
                     n_per_group, eps):
    # x_ref: (R, HWp) with R = Nb*C ; w/b: (R, 1) ; agg: (GB, R) ; scat: (R, GB)
    # Single-pass stats straight off the block read (no persistent f32 slab).
    xf = x_ref[...].astype(jnp.float32)
    s1 = jnp.sum(xf, axis=1, keepdims=True)                  # (R, 1)
    s2 = jnp.sum(xf * xf, axis=1, keepdims=True)             # (R, 1)
    stats = jnp.concatenate([s1, s2], axis=1)                # (R, 2)

    # One MXU matmul aggregates both moments channels -> groups.
    g = jnp.dot(agg_ref[...], stats, preferred_element_type=jnp.float32)  # (GB, 2)
    inv_n = jnp.float32(1.0 / n_per_group)
    mean_g = g[:, 0:1] * inv_n
    var_g = jnp.maximum(g[:, 1:2] * inv_n - mean_g * mean_g, 0.0)
    rstd_g = jax.lax.rsqrt(var_g + eps)

    # One MXU matmul scatters (mean, rstd) groups -> channels.
    per_c = jnp.dot(scat_ref[...], jnp.concatenate([mean_g, rstd_g], axis=1),
                    preferred_element_type=jnp.float32)       # (R, 2)

    scale = w_ref[...].astype(jnp.float32) * per_c[:, 1:2]    # (R, 1)
    shift = b_ref[...].astype(jnp.float32) - per_c[:, 0:1] * scale

    # Re-read the resident block for the apply (no HBM traffic, no slab temp).
    o_ref[...] = (x_ref[...].astype(jnp.float32) * scale + shift).astype(o_ref.dtype)


# ----------------------------------------------------------------------------
# Two-pass fallback (slab too big for VMEM): HW-tiled stats, then apply.
# ----------------------------------------------------------------------------
def _gn_stats_kernel(x_ref, w_ref, b_ref, agg_ref, scat_ref, ss_ref, acc_ref, *,
                     n_per_group, eps):
    # x_ref: (C, THW); w/b: (C, 1); agg: (G, C); scat: (C, G)
    # ss_ref: (C, 2) folded (scale, shift) output; acc_ref: (C, 2) f32 scratch.
    @pl.when(pl.program_id(1) == 0)
    def _():
        acc_ref[...] = jnp.zeros_like(acc_ref)

    xf = x_ref[...].astype(jnp.float32)
    s1 = jnp.sum(xf, axis=1, keepdims=True)
    s2 = jnp.sum(xf * xf, axis=1, keepdims=True)
    acc_ref[...] += jnp.concatenate([s1, s2], axis=1)

    @pl.when(pl.program_id(1) == pl.num_programs(1) - 1)
    def _():
        g = jnp.dot(agg_ref[...], acc_ref[...], preferred_element_type=jnp.float32)
        inv_n = jnp.float32(1.0 / n_per_group)
        mean_g = g[:, 0:1] * inv_n
        var_g = jnp.maximum(g[:, 1:2] * inv_n - mean_g * mean_g, 0.0)
        rstd_g = jax.lax.rsqrt(var_g + eps)
        per_c = jnp.dot(scat_ref[...], jnp.concatenate([mean_g, rstd_g], axis=1),
                        preferred_element_type=jnp.float32)   # (C, 2)
        scale = w_ref[...].astype(jnp.float32) * per_c[:, 1:2]
        shift = b_ref[...].astype(jnp.float32) - per_c[:, 0:1] * scale
        ss_ref[...] = jnp.concatenate([scale, shift], axis=1)


def _gn_apply_kernel(x_ref, ss_ref, o_ref):
    scale = ss_ref[:, 0:1]
    shift = ss_ref[:, 1:2]
    o_ref[...] = (x_ref[...].astype(jnp.float32) * scale + shift).astype(o_ref.dtype)


# ----------------------------------------------------------------------------
# Wrapper
# ----------------------------------------------------------------------------
def gn_8(x, weight, bias, *, force_two_pass=False):
    """GroupNorm(8, C) over NCHW input x, affine weight/bias of shape (C,)."""
    N, C, H, W = x.shape
    G = NUM_GROUPS
    assert C % G == 0, "num_channels must be divisible by 8"
    cpg = C // G
    HW = H * W
    HWp = _round_up(HW, 128)        # lane-dense blocks (unmasked stores)
    elt = jnp.dtype(x.dtype).itemsize

    x3 = x.reshape(N, C, HW)
    if HWp != HW:
        # Zero padding does not perturb s1/s2; true count used for mean/var.
        x3 = jnp.pad(x3, ((0, 0), (0, 0), (0, HWp - HW)))

    budget = _vmem_budget_bytes()
    per_batch_block = C * HWp * elt

    def fused_need(nb):
        # in+out double-buffered blocks + transient f32 working sets + headroom
        blk = nb * per_batch_block
        return 4 * blk + 2 * nb * C * HWp * 4 + (2 << 20)

    # Pack several batches per grid step while the block stays <= ~2 MiB
    # (amortizes the ~0.35 us per-step overhead) and fits the VMEM budget.
    nb = 1
    for cand in range(1, N + 1):
        if N % cand:
            continue
        if cand * per_batch_block <= (2 << 20) and fused_need(cand) <= budget:
            nb = cand

    use_fused = (not force_two_pass) and fused_need(nb) <= budget

    w1 = weight.astype(jnp.float32)
    b1 = bias.astype(jnp.float32)

    ce = pl.CostEstimate(
        flops=int(6 * N * C * HW),
        transcendentals=int(N * G),
        bytes_accessed=int(2 * N * C * HW * elt),
    )

    if use_fused:
        R = nb * C
        GB = nb * G
        x2 = x3.reshape(N * C, HWp)

        # Block-diagonal group indicators over the packed (Nb*C) channel axis:
        # global channel j = b*C + c belongs to global group j // cpg.
        cidx = jnp.arange(R, dtype=jnp.int32)
        gidx = jnp.arange(GB, dtype=jnp.int32)
        agg = (cidx[None, :] // cpg == gidx[:, None]).astype(jnp.float32)  # (GB, R)
        scat = jnp.transpose(agg)                                           # (R, GB)
        w2 = jnp.tile(w1, (nb,)).reshape(R, 1)
        b2 = jnp.tile(b1, (nb,)).reshape(R, 1)

        kernel = functools.partial(_gn_fused_kernel, n_per_group=cpg * HW, eps=EPS)
        vmem_limit = int(min(max(fused_need(nb), 32 << 20), budget))

        out = pl.pallas_call(
            kernel,
            out_shape=jax.ShapeDtypeStruct((N * C, HWp), x.dtype),
            grid=(N // nb,),
            in_specs=[
                pl.BlockSpec((R, HWp), lambda i: (i, 0)),
                # params / indicators: constant block index -> resident in VMEM
                pl.BlockSpec((R, 1), lambda i: (0, 0)),
                pl.BlockSpec((R, 1), lambda i: (0, 0)),
                pl.BlockSpec((GB, R), lambda i: (0, 0)),
                pl.BlockSpec((R, GB), lambda i: (0, 0)),
            ],
            out_specs=pl.BlockSpec((R, HWp), lambda i: (i, 0)),
            compiler_params=pltpu.CompilerParams(
                dimension_semantics=("parallel",),
                vmem_limit_bytes=vmem_limit,
            ),
            cost_estimate=ce,
        )(x2, w2, b2, agg, scat)

        out = out.reshape(N, C, HWp)
    else:
        # ------------------------------------------------------------------
        # Fallback: HW-tiled two-pass (one extra HBM read of x, but no giant
        # resident slab). Used when the fused slab exceeds the VMEM budget.
        # ------------------------------------------------------------------
        cidx = jnp.arange(C, dtype=jnp.int32)
        gidx = jnp.arange(G, dtype=jnp.int32)
        agg = (cidx[None, :] // cpg == gidx[:, None]).astype(jnp.float32)  # (G, C)
        scat = jnp.transpose(agg)                                           # (C, G)
        w2 = w1.reshape(C, 1)
        b2 = b1.reshape(C, 1)

        # HW tile: multiple of 128, divides HWp, block <= ~4 MiB.
        lanes = HWp // 128
        max_lanes = max(1, (4 << 20) // (C * max(elt, 4) * 128))
        t_lanes = 1
        for d in range(1, lanes + 1):
            if lanes % d == 0 and d <= max_lanes:
                t_lanes = d
        thw = t_lanes * 128
        n_hw = HWp // thw
        fb_vmem = int(min(max(6 * C * thw * max(elt, 4) + (4 << 20), 32 << 20), budget))

        stats_kernel = functools.partial(_gn_stats_kernel, n_per_group=cpg * HW, eps=EPS)
        ss = pl.pallas_call(
            stats_kernel,
            out_shape=jax.ShapeDtypeStruct((N, C, 2), jnp.float32),
            grid=(N, n_hw),
            in_specs=[
                pl.BlockSpec((None, C, thw), lambda n, h: (n, 0, h)),
                pl.BlockSpec((C, 1), lambda n, h: (0, 0)),
                pl.BlockSpec((C, 1), lambda n, h: (0, 0)),
                pl.BlockSpec((G, C), lambda n, h: (0, 0)),
                pl.BlockSpec((C, G), lambda n, h: (0, 0)),
            ],
            out_specs=pl.BlockSpec((None, C, 2), lambda n, h: (n, 0, 0)),
            scratch_shapes=[pltpu.VMEM((C, 2), jnp.float32)],
            compiler_params=pltpu.CompilerParams(
                dimension_semantics=("parallel", "arbitrary"),
                vmem_limit_bytes=fb_vmem,
            ),
        )(x3, w2, b2, agg, scat)

        out = pl.pallas_call(
            _gn_apply_kernel,
            out_shape=jax.ShapeDtypeStruct((N, C, HWp), x.dtype),
            grid=(N, n_hw),
            in_specs=[
                pl.BlockSpec((None, C, thw), lambda n, h: (n, 0, h)),
                pl.BlockSpec((None, C, 2), lambda n, h: (n, 0, 0)),
            ],
            out_specs=pl.BlockSpec((None, C, thw), lambda n, h: (n, 0, h)),
            compiler_params=pltpu.CompilerParams(
                dimension_semantics=("parallel", "parallel"),
                vmem_limit_bytes=fb_vmem,
            ),
            cost_estimate=ce,
        )(x3, ss)

    if HWp != HW:
        out = out[:, :, :HW]
    return out.reshape(N, C, H, W)


def gn_8_reference(x, weight, bias):
    """Pure-JAX reference matching torch.nn.GroupNorm(8, C) semantics."""
    N, C, H, W = x.shape
    G = NUM_GROUPS
    xg = x.reshape(N, G, -1).astype(jnp.float32)
    mean = xg.mean(axis=-1, keepdims=True)
    var = jnp.mean((xg - mean) ** 2, axis=-1, keepdims=True)
    xn = (xg - mean) / jnp.sqrt(var + EPS)
    xn = xn.reshape(N, C, H, W)
    return (xn * weight.reshape(1, C, 1, 1) + bias.reshape(1, C, 1, 1)).astype(x.dtype)


if __name__ == "__main__":
    key = jax.random.PRNGKey(0)

    def run_case(N, C, H, W, force_two_pass=False):
        kx, kw, kb = jax.random.split(jax.random.fold_in(key, N * 1000 + H), 3)
        x = jax.random.normal(kx, (N, C, H, W), dtype=jnp.float32)
        weight = 1.0 + 0.1 * jax.random.normal(kw, (C,), dtype=jnp.float32)
        bias = 0.1 * jax.random.normal(kb, (C,), dtype=jnp.float32)
        out = jax.block_until_ready(gn_8(x, weight, bias, force_two_pass=force_two_pass))
        ref = gn_8_reference(x, weight, bias)
        assert out.shape == (N, C, H, W)
        assert jnp.allclose(out, ref, rtol=1e-5, atol=1e-4), (
            f"max abs err {jnp.max(jnp.abs(out - ref))}")

    # fused single-pass path, lane-aligned HW
    run_case(2, 16, 16, 16)
    # fused path with lane padding (HW = 49 -> padded to 128)
    run_case(2, 16, 7, 7)
    # tiled two-pass fallback path (forced at a small shape to validate it)
    run_case(2, 16, 16, 16, force_two_pass=True)

    print("KERNEL_OK")
</pallas_src>

<mosaic_0001>
module attributes {stable_mosaic.version = 11 : i64} {
  func.func @_gn_fused_kernel(%arg0: i32, %arg1: memref<32x256xf32, #tpu.memory_space<vmem>>, %arg2: memref<32x1xf32, #tpu.memory_space<vmem>>, %arg3: memref<32x1xf32, #tpu.memory_space<vmem>>, %arg4: memref<16x32xf32, #tpu.memory_space<vmem>>, %arg5: memref<32x16xf32, #tpu.memory_space<vmem>>, %arg6: memref<32x256xf32, #tpu.memory_space<vmem>>) attributes {dimension_semantics = [#tpu.dimension_semantics<parallel>], iteration_bounds = array<i64: 1>, scalar_prefetch = 0 : i64, scratch_operands = 0 : i64, tpu.core_type = #tpu.core_type<tc>, window_params = [{transform_indices = @transform_0, window_bounds = array<i64: 32, 256>}, {pipeline_mode = #tpu.pipeline_mode<synchronous>, transform_indices = @transform_1, window_bounds = array<i64: 32, 1>}, {pipeline_mode = #tpu.pipeline_mode<synchronous>, transform_indices = @transform_2, window_bounds = array<i64: 32, 1>}, {pipeline_mode = #tpu.pipeline_mode<synchronous>, transform_indices = @transform_3, window_bounds = array<i64: 16, 32>}, {pipeline_mode = #tpu.pipeline_mode<synchronous>, transform_indices = @transform_4, window_bounds = array<i64: 32, 16>}, {transform_indices = @transform_5, window_bounds = array<i64: 32, 256>}]} {
    %c0 = arith.constant 0 : index
    %c0_0 = arith.constant 0 : index
    %0 = vector.load %arg1[%c0, %c0_0] : memref<32x256xf32, #tpu.memory_space<vmem>>, vector<32x256xf32>
    %cst = arith.constant dense<0.000000e+00> : vector<32xf32>
    %1 = vector.multi_reduction <add>, %0, %cst [1] : vector<32x256xf32> to vector<32xf32>
    %2 = vector.shape_cast %1 : vector<32xf32> to vector<32x1xf32>
    %3 = arith.mulf %0, %0 : vector<32x256xf32>
    %cst_1 = arith.constant dense<0.000000e+00> : vector<32xf32>
    %4 = vector.multi_reduction <add>, %3, %cst_1 [1] : vector<32x256xf32> to vector<32xf32>
    %5 = vector.shape_cast %4 : vector<32xf32> to vector<32x1xf32>
    %6 = tpu.concatenate %2, %5 in 1 : vector<32x1xf32>, vector<32x1xf32> -> vector<32x2xf32>
    %c0_2 = arith.constant 0 : index
    %c0_3 = arith.constant 0 : index
    %7 = vector.load %arg4[%c0_2, %c0_3] : memref<16x32xf32, #tpu.memory_space<vmem>>, vector<16x32xf32>
    %cst_4 = arith.constant dense<0.000000e+00> : vector<16x2xf32>
    %8 = tpu.matmul %7, %6, %cst_4 {dimension_numbers = #tpu.dot_dimension_numbers<[1], [0], [0], [1], [0, 0, 1, 1], [], []>} : vector<16x32xf32>, vector<32x2xf32>, vector<16x2xf32> -> vector<16x2xf32>
    %9 = vector.extract_strided_slice %8 {offsets = [0, 0], sizes = [16, 1], strides = [1, 1]} : vector<16x2xf32> to vector<16x1xf32>
    %cst_5 = arith.constant 0.001953125 : f32
    %10 = vector.broadcast %cst_5 : f32 to vector<16x1xf32>
    %11 = arith.mulf %9, %10 : vector<16x1xf32>
    %12 = vector.extract_strided_slice %8 {offsets = [0, 1], sizes = [16, 1], strides = [1, 1]} : vector<16x2xf32> to vector<16x1xf32>
    %cst_6 = arith.constant 0.001953125 : f32
    %13 = vector.broadcast %cst_6 : f32 to vector<16x1xf32>
    %14 = arith.mulf %12, %13 : vector<16x1xf32>
    %15 = arith.mulf %11, %11 : vector<16x1xf32>
    %16 = arith.subf %14, %15 : vector<16x1xf32>
    %cst_7 = arith.constant 0.000000e+00 : f32
    %17 = vector.broadcast %cst_7 : f32 to vector<16x1xf32>
    %18 = arith.maximumf %16, %17 : vector<16x1xf32>
    %cst_8 = arith.constant 9.99999974E-6 : f32
    %19 = vector.broadcast %cst_8 : f32 to vector<16x1xf32>
    %20 = arith.addf %18, %19 : vector<16x1xf32>
    %21 = math.rsqrt %20 : vector<16x1xf32>
    %c0_9 = arith.constant 0 : index
    %c0_10 = arith.constant 0 : index
    %22 = vector.load %arg5[%c0_9, %c0_10] : memref<32x16xf32, #tpu.memory_space<vmem>>, vector<32x16xf32>
    %23 = tpu.concatenate %11, %21 in 1 : vector<16x1xf32>, vector<16x1xf32> -> vector<16x2xf32>
    %cst_11 = arith.constant dense<0.000000e+00> : vector<32x2xf32>
    %24 = tpu.matmul %22, %23, %cst_11 {dimension_numbers = #tpu.dot_dimension_numbers<[1], [0], [0], [1], [0, 0, 1, 1], [], []>} : vector<32x16xf32>, vector<16x2xf32>, vector<32x2xf32> -> vector<32x2xf32>
    %c0_12 = arith.constant 0 : index
    %c0_13 = arith.constant 0 : index
    %25 = vector.load %arg2[%c0_12, %c0_13] : memref<32x1xf32, #tpu.memory_space<vmem>>, vector<32x1xf32>
    %26 = vector.extract_strided_slice %24 {offsets = [0, 1], sizes = [32, 1], strides = [1, 1]} : vector<32x2xf32> to vector<32x1xf32>
    %27 = arith.mulf %25, %26 : vector<32x1xf32>
    %c0_14 = arith.constant 0 : index
    %c0_15 = arith.constant 0 : index
    %28 = vector.load %arg3[%c0_14, %c0_15] : memref<32x1xf32, #tpu.memory_space<vmem>>, vector<32x1xf32>
    %29 = vector.extract_strided_slice %24 {offsets = [0, 0], sizes = [32, 1], strides = [1, 1]} : vector<32x2xf32> to vector<32x1xf32>
    %30 = arith.mulf %29, %27 : vector<32x1xf32>
    %31 = arith.subf %28, %30 : vector<32x1xf32>
    %c0_16 = arith.constant 0 : index
    %c0_17 = arith.constant 0 : index
    %32 = vector.load %arg1[%c0_16, %c0_17] : memref<32x256xf32, #tpu.memory_space<vmem>>, vector<32x256xf32>
    %33 = vector.broadcast %27 : vector<32x1xf32> to vector<32x256xf32>
    %34 = arith.mulf %32, %33 : vector<32x256xf32>
    %35 = vector.broadcast %31 : vector<32x1xf32> to vector<32x256xf32>
    %36 = arith.addf %34, %35 : vector<32x256xf32>
    %c0_18 = arith.constant 0 : index
    %c0_19 = arith.constant 0 : index
    %37 = vector.load %arg6[%c0_18, %c0_19] : memref<32x256xf32, #tpu.memory_space<vmem>>, vector<32x256xf32>
    tpu.vector_store %arg6[%c0_18, %c0_19], %36 {strides = array<i32>} : memref<32x256xf32, #tpu.memory_space<vmem>>, vector<32x256xf32>,
    return
  }
  func.func @transform_0(%arg0: i32) -> (i32, i32) {
    %c0_i32 = arith.constant 0 : i32
    %c0_i32_0 = arith.constant 0 : i32
    return %arg0, %c0_i32 : i32, i32
  }
  func.func @transform_1(%arg0: i32) -> (i32, i32) {
    %c0_i32 = arith.constant 0 : i32
    %c0_i32_0 = arith.constant 0 : i32
    %c0_i32_1 = arith.constant 0 : i32
    return %c0_i32, %c0_i32_0 : i32, i32
  }
  func.func @transform_2(%arg0: i32) -> (i32, i32) {
    %c0_i32 = arith.constant 0 : i32
    %c0_i32_0 = arith.constant 0 : i32
    %c0_i32_1 = arith.constant 0 : i32
    return %c0_i32, %c0_i32_0 : i32, i32
  }
  func.func @transform_3(%arg0: i32) -> (i32, i32) {
    %c0_i32 = arith.constant 0 : i32
    %c0_i32_0 = arith.constant 0 : i32
    %c0_i32_1 = arith.constant 0 : i32
    return %c0_i32, %c0_i32_0 : i32, i32
  }
  func.func @transform_4(%arg0: i32) -> (i32, i32) {
    %c0_i32 = arith.constant 0 : i32
    %c0_i32_0 = arith.constant 0 : i32
    %c0_i32_1 = arith.constant 0 : i32
    return %c0_i32, %c0_i32_0 : i32, i32
  }
  func.func @transform_5(%arg0: i32) -> (i32, i32) {
    %c0_i32 = arith.constant 0 : i32
    %c0_i32_0 = arith.constant 0 : i32
    return %arg0, %c0_i32 : i32, i32
  }
}

</mosaic_0001>

<bundles_post_ra>
// kernel: tpu_custom_call.1
= control target key start
LH: loop header
LB: loop body
LE: loop exit
PB: predicated region body
PF: predicated region fallthrough
CT: control target
= control target key end

     0   :  { %s651_s0 = inlined_call_operand.vmem [shape: f32[32,256], index: 0, kind: input, shape index: {}]   ;;  %s652_s1 = inlined_call_operand.vmem [shape: f32[32,1], index: 1, kind: input, shape index: {}]   ;;  %s653_s2 = inlined_call_operand.vmem [shape: f32[32,1], index: 2, kind: input, shape index: {}]   ;;  %s654_s3 = inlined_call_operand.vmem [shape: f32[16,32], index: 3, kind: input, shape index: {}]   ;;  %s655_s4 = inlined_call_operand.vmem [shape: f32[32,16], index: 4, kind: input, shape index: {}]   ;;  %s656_s5 = inlined_call_operand.hbm [shape: f32[32,256], index: 5, kind: output, shape index: {}]  }
   0x1   :  { %v516_v0 = vld [vmem:[%s651_s0] sm:$0xff]  ;;  %v521_v1 = vld [vmem:[%s651_s0 + $0x8] sm:$0xff]  ;;  %v526_v2 = vld [vmem:[%s651_s0 + $0x10] sm:$0xff] }
   0x2   :  { %v29_v3 = vadd.f32 %v521_v1, %v516_v0  ;;  %v41_v4 = vmul.f32 %v516_v0, %v516_v0  ;;  %v42_v5 = vmul.f32 %v521_v1, %v521_v1  ;;  %v537_v6 = vld [vmem:[%s651_s0 + $0x18] sm:$0xff]  ;;  %v43_v7 = vmul.f32 %v526_v2, %v526_v2 }
   0x3   :  { %v44_v8 = vmul.f32 %v537_v6, %v537_v6 }
   0x4   :  { %10 = vsyncpa [#allocation3], 0  ;;  %30 = vadd.xlane.f32.xlu0 %v29_v3  ;;  %v49_v9 = vadd.f32 %v42_v5, %v41_v4  ;;  %v32_v10 = vadd.f32 %v537_v6, %v526_v2  ;;  %v548_v11 = vld [vmem:[%s651_s0 + $0x20] sm:$0xff]  ;;  %v553_v12 = vld [vmem:[%s651_s0 + $0x28] sm:$0xff]  ;;  %vm68_vm0 = vcmask 261120   ;;  %vm61_vm1 = vcmask 7168  }
   0x5   :  { %v52_v13 = vadd.f32 %v44_v8, %v43_v7  ;;  %v558_v14 = vld [vmem:[%s651_s0 + $0x30] sm:$0xff]  ;;  %v563_v15 = vld [vmem:[%s651_s0 + $0x38] sm:$0xff]  ;;  %v35_v16 = vadd.f32 %v553_v12, %v548_v11  ;;  %v45_v17 = vmul.f32 %v548_v11, %v548_v11  ;;  %v46_v18 = vmul.f32 %v553_v12, %v553_v12  ;;  %v66_v24 = vld [vmem:[%s654_s3] sm:$0xff]  ;;  %s477_s12 = smov 1   ;;  %s479_s20 = smov 127  }
   0x6   :  { %50 = vadd.xlane.f32.xlu1 %v49_v9  ;;  %v38_v19 = vadd.f32 %v563_v15, %v558_v14  ;;  %v47_v20 = vmul.f32 %v558_v14, %v558_v14  ;;  %v48_v21 = vmul.f32 %v563_v15, %v563_v15  ;;  %416 = vmatprep.mubr.msk.f32.mxu0 %vm68_vm0, %v66_v24  ;;  %v67_v39 = vld [vmem:[%s654_s3 + $0x8] sm:$0xff]  ;;  %v170_v46 = vld [vmem:[%s655_s4] sm:$0xff]  ;;  %vm176_vm2 = vcmask 130048   ;;  %v172_v61 = vld [vmem:[%s655_s4 + $0x10] sm:$0xff] }
   0x7   :  { %v55_v22 = vadd.f32 %v46_v18, %v45_v17  ;;  %423 = vmatprep.mubr.msk.f32.mxu1 %vm176_vm2, %v170_v46  ;;  %v171_v60 = vld [vmem:[%s655_s4 + $0x8] sm:$0xff]  ;;  %v173_v62 = vld [vmem:[%s655_s4 + $0x18] sm:$0xff]  ;;  %v478_v63 = vmov 0  }
   0x8   :  { %33 = vadd.xlane.f32.xlu0 %v32_v10  ;;  %v58_v23 = vadd.f32 %v48_v21, %v47_v20  ;;  %447 = vset.pattern.permute.xlu1 %v478_v63  ;;  %v275_v8 = vld [vmem:[%s652_s1 + $0x8] sm:$0xff]  ;;  %v277_v21 = vld [vmem:[%s652_s1 + $0x18] sm:$0xff] }
   0x9   :  { %448 = vset.pattern.permute.xlu0 %v478_v63 }
   0xa   :  { %53 = vadd.xlane.f32.xlu1 %v52_v13  ;;  %v274_v13 = vld [vmem:[%s652_s1] sm:$0xff] }
   0xc   :  { %36 = vadd.xlane.f32.xlu0 %v35_v16  ;;  %v276_v16 = vld [vmem:[%s652_s1 + $0x10] sm:$0xff] }
   0xe   :  { %39 = vadd.xlane.f32.xlu1 %v38_v19 }
  0x10   :  { %56 = vadd.xlane.f32.xlu0 %v55_v22  ;;  %v298_v22 = vld [vmem:[%s653_s2] sm:$0xff] }
  0x12   :  { %59 = vadd.xlane.f32.xlu1 %v58_v23 }
  0x91   :  { %v31_v25 = vpop.xlane.xlu0 %30 }
  0x93   :  { %v51_v26 = vpop.xlane.xlu1 %50 }
  0x94   :  { %v62_v29 = vsel %vm61_vm1, %v31_v25, %v51_v26 }
  0x95   :  { %v34_v27 = vpop.xlane.xlu0 %33 }
  0x97   :  { %v54_v28 = vpop.xlane.xlu1 %53 }
  0x98   :  { %v63_v30 = vsel %vm61_vm1, %v34_v27, %v54_v28 }
  0x99   :  { %v37_v31 = vpop.xlane.xlu0 %36  ;;  %v429_v32 = vpack.c.bf16 %v63_v30, %v62_v29  ;;  %v299_v29 = vld [vmem:[%s653_s2 + $0x8] sm:$0xff]  ;;  %v300_v30 = vld [vmem:[%s653_s2 + $0x10] sm:$0xff] }
  0x9b   :  { %v40_v33 = vpop.xlane.xlu1 %39  ;;  %430 = vmatprep.subr.bf16.mxu0 %v429_v32 }
  0x9c   :  { %432 = vmatpush3.bf16.msra.mxu0 %v429_v32 }
  0x9d   :  { %v57_v34 = vpop.xlane.xlu0 %56 }
  0x9e   :  { %v64_v36 = vsel %vm61_vm1, %v37_v31, %v57_v34  ;;  %v301_v34 = vld [vmem:[%s653_s2 + $0x18] sm:$0xff]  ;;  %s480_s2 = smov [#allocation2]  }
  0x9f   :  { %v60_v35 = vpop.xlane.xlu1 %59  ;;  %s379_s9 = sshll.u32 %s480_s2, 4  ;;  %s380_s9 = int_to_ptr.vmem [resolvable:$true] %s379_s9 }
  0xa0   :  { %v65_v37 = vsel %vm61_vm1, %v40_v33, %v60_v35  ;;  %s453_s10 = scalar_lea.vmem %s380_s9, 1024  ;;  %p458_p1 = scmp.lt.s32.totalorder %s380_s9, %s380_s9 }
  0xa1   :  { %v433_v38 = vpack.c.bf16 %v65_v37, %v64_v36  ;;  %p454_p0 = scmp.ne.s32.totalorder %s380_s9, %s453_s10  ;;  %p459_p2 = scmp.lt.s32.totalorder %s453_s10, %s453_s10 }
  0xa3   :  { %434 = vmatprep.subr.bf16.mxu0 %v433_v38  ;;  %p460_p3 = por %p459_p2, %p458_p1 }
  0xa4   :  { %436 = vmatpush3.bf16.msra.mxu0 %v433_v38 }
  0xa5   :  { %p461_p4 = pnand %p460_p3, %p454_p0 }
  0xa7   :  { %417 = vmatmul.mubr.msk.f32.vlgmr.msra.gmra.mrb[0].mxu0 %vm68_vm0, %v67_v39 }
 0x17a   :  { %v418_v40 = vpop.f32.mrb[0].mxu0 }
 0x17b   :  { %v151_v41 = vmul.f32 0.001953125, %v418_v40  ;;  %v141_v42 = vpop.f32.mrb[1].mxu0 }
 0x17c   :  { %v150_v43 = vmul.f32 0.001953125, %v141_v42 }
 0x17d   :  { %v153_v44 = vmul.f32 %v151_v41, %v151_v41 }
 0x17e   :  { %v152_v45 = vmul.f32 %v150_v43, %v150_v43 }
 0x17f   :  { %158 = vrot.lane.b32.xlu1 %v153_v44, %s477_s12 }
 0x180   :  { %156 = vrot.lane.b32.xlu0 %v152_v45, %s477_s12 }
 0x1f1   :  { %v159_v47 = vpop.permute.xlu1 %158 }
 0x1f2   :  { %v163_v48 = vsub.f32 %v151_v41, %v159_v47  ;;  %v157_v49 = vpop.permute.xlu0 %156 }
 0x1f3   :  { %v162_v50 = vsub.f32 %v150_v43, %v157_v49 }
 0x1f4   :  { %v165_v51 = vmax.f32 %v163_v48, 0.0 }
 0x1f5   :  { %v164_v52 = vmax.f32 %v162_v50, 0.0 }
 0x1f6   :  { %v167_v53 = vadd.f32 1e-05, %v165_v51 }
 0x1f7   :  { %v166_v54 = vadd.f32 1e-05, %v164_v52 }
 0x1f8   :  { %449 = vrsqrt.f32 %v167_v53 }
 0x1f9   :  { %451 = vrsqrt.f32 %v166_v54 }
 0x202   :  { %v450_v55 = vpop.eup %449 }
 0x203   :  { %v452_v56 = vpop.eup %451  ;;  %v175_v57 = vsel %vm61_vm1, %v151_v41, %v450_v55 }
 0x204   :  { %v174_v58 = vsel %vm61_vm1, %v150_v43, %v452_v56 }
 0x205   :  { %v437_v59 = vpack.c.bf16 %v175_v57, %v174_v58 }
 0x207   :  { %438 = vmatprep.subr.bf16.mxu1 %v437_v59 }
 0x208   :  { %440 = vmatpush3.bf16.msra.mxu1 %v437_v59 }
 0x20b   :  { %424 = vmatmul.mubr.msk.f32.vlgmr.msra.gmra.mrb[0].mxu1 %vm176_vm2, %v171_v60 }
 0x20c   :  { %426 = vmatprep.mubr.msk.f32.mxu1 %vm176_vm2, %v172_v61 }
 0x20f   :  { %427 = vmatmul.mubr.msk.f32.gmra.mrb[2].mxu1 %vm176_vm2, %v173_v62 }
 0x2de   :  { %v425_v3 = vpop.f32.mrb[0].mxu1 }
 0x2df   :  { %284 = vrot.lane.b32.xlu1 %v425_v3, %s479_s20  ;;  %v255_v4 = vpop.f32.mrb[1].mxu1 }
 0x2e2   :  { %v428_v5 = vpop.f32.mrb[2].mxu1 }
 0x2e3   :  { %282 = vrot.lane.b32.xlu1 %v255_v4, %s479_s20  ;;  %v265_v7 = vpop.f32.mrb[3].mxu1 }
 0x2e4   :  { %286 = vrot.lane.b32.xlu0 %v265_v7, %s479_s20 }
 0x2e7   :  { %288 = vrot.lane.b32.xlu1 %v428_v5, %s479_s20 }
 0x351   :  { %v285_v9 = vpop.permute.xlu1 %284 }
 0x352   :  { %v295_v10 = vmul.f32 %v285_v9, %v275_v8 }
 0x354   :  { %317 = vperm.xlu1 %447, %v295_v10   ;;  %v303_v25 = vmul.f32 %v425_v3, %v295_v10 }
 0x355   :  { %v283_v17 = vpop.permute.xlu1 %282 }
 0x356   :  { %v294_v18 = vmul.f32 %v283_v17, %v274_v13  ;;  %v287_v19 = vpop.permute.xlu0 %286  ;;  %v307_v32 = vsub.f32 %v299_v29, %v303_v25 }
 0x357   :  { %v296_v20 = vmul.f32 %v287_v19, %v276_v16 }
 0x358   :  { %v302_v23 = vmul.f32 %v294_v18, %v255_v4  ;;  %312 = vperm.xlu0 %448, %v294_v18  }
 0x359   :  { %v289_v24 = vpop.permute.xlu1 %288  ;;  %322 = vperm.xlu1 %447, %v296_v20   ;;  %v304_v28 = vmul.f32 %v296_v20, %v265_v7 }
 0x35a   :  { %v297_v26 = vmul.f32 %v289_v24, %v277_v21  ;;  %v306_v27 = vsub.f32 %v298_v22, %v302_v23 }
 0x35b   :  { %v308_v33 = vsub.f32 %v300_v30, %v304_v28 }
 0x35c   :  { %327 = vperm.xlu0 %448, %v297_v26   ;;  %v305_v31 = vmul.f32 %v428_v5, %v297_v26 }
 0x35d   :  { %340 = vperm.xlu1 %447, %v306_v27  }
 0x35e   :  { %v309_v35 = vsub.f32 %v301_v34, %v305_v31 }
 0x360   :  { %345 = vperm.xlu0 %448, %v307_v32  }
 0x361   :  { %350 = vperm.xlu1 %447, %v308_v33  }
 0x364   :  { %355 = vperm.xlu0 %448, %v309_v35  }
 0x3d3   :  { %v318_v36 = vpop.permute.xlu1 %317 }
 0x3d4   :  { %v332_v45 = vmul.f32 %v318_v36, %v526_v2  ;;  %v333_v46 = vmul.f32 %v318_v36, %v537_v6 }
 0x3d7   :  { %v313_v37 = vpop.permute.xlu0 %312 }
 0x3d8   :  { %v323_v38 = vpop.permute.xlu1 %322  ;;  %v330_v39 = vmul.f32 %v313_v37, %v516_v0  ;;  %v331_v40 = vmul.f32 %v313_v37, %v521_v1 }
 0x3d9   :  { %v334_v47 = vmul.f32 %v323_v38, %v548_v11  ;;  %v335_v48 = vmul.f32 %v323_v38, %v553_v12 }
 0x3db   :  { %v328_v41 = vpop.permute.xlu0 %327 }
 0x3dc   :  { %v341_v42 = vpop.permute.xlu1 %340  ;;  %v336_v53 = vmul.f32 %v328_v41, %v558_v14  ;;  %v337_v2 = vmul.f32 %v328_v41, %v563_v15 }
 0x3dd   :  { %v358_v43 = vadd.f32 %v341_v42, %v330_v39  ;;  %v359_v44 = vadd.f32 %v341_v42, %v331_v40 }
 0x3df   :  { %366 = vst [vmem:[#allocation2] sm:$0xff] %v358_v43  ;;  %367 = vst [vmem:[#allocation2 + $0x8] sm:$0xff] %v359_v44  ;;  %v346_v49 = vpop.permute.xlu0 %345 }
 0x3e0   :  { %v360_v50 = vadd.f32 %v346_v49, %v332_v45  ;;  %v361_v51 = vadd.f32 %v346_v49, %v333_v46  ;;  %v351_v0 = vpop.permute.xlu1 %350 }
 0x3e1   :  { %v362_v1 = vadd.f32 %v351_v0, %v334_v47  ;;  %v363_v52 = vadd.f32 %v351_v0, %v335_v48 }
 0x3e2   :  { %368 = vst [vmem:[#allocation2 + $0x10] sm:$0xff] %v360_v50  ;;  %369 = vst [vmem:[#allocation2 + $0x18] sm:$0xff] %v361_v51 }
 0x3e3   :  { %370 = vst [vmem:[#allocation2 + $0x20] sm:$0xff] %v362_v1  ;;  %371 = vst [vmem:[#allocation2 + $0x28] sm:$0xff] %v363_v52  ;;  %v356_v6 = vpop.permute.xlu0 %355 }
 0x3e4   :  { %v364_v11 = vadd.f32 %v356_v6, %v336_v53  ;;  %v365_v12 = vadd.f32 %v356_v6, %v337_v2 }
 0x3e6   :  { %372 = vst [vmem:[#allocation2 + $0x30] sm:$0xff] %v364_v11  ;;  %373 = vst [vmem:[#allocation2 + $0x38] sm:$0xff] %v365_v12 }
 0x3e7   :  { %464 = shalt.err (!%p461_p4)
}
 0x3e8   :  { %s465_s13 = scalar_lea.hbm %s656_s5, 1024 }
 0x3e9   :  { %p466_p5 = scmp.ne.s32.totalorder %s656_s5, %s465_s13  ;;  %p469_p6 = scmp.lt.u32.totalorder %s465_s13, %s656_s5 }
 0x3eb   :  { %p471_p7 = pnand %p469_p6, %p466_p5 }
 0x3ed   :  { %474 = shalt.err (!%p471_p7)
}
 0x3ee   :  { %s481_s17 = smov 256   ;;  %s482_s18 = smov 16  }
 0x3ef   :  { %385 = dma.vmem_to_hbm [thread:$0]  %s380_s9, 1024, %s656_s5, [#allocation3], %s481_s17, %s481_s17, %s482_s18  }
 0x3f0   :  { %475 = dma.done.wait [#allocation3], 1024  }
 0x3f1   :  { %476 = vsyncadd [#allocation3], 4294966272 }
 0x3f2   :  { %389 = vsyncpa [#allocation3], 1 }

</bundles_post_ra>
